<compile_context>
chip_gen: v7x
topology: tpu7x:2x2x1
jax: 0.10.0
libtpu: 0.0.40
codegen_flags: <defaults>
</compile_context>

<pallas_src>
import functools

import jax
import jax.numpy as jnp
from jax.experimental import pallas as pl
from jax.experimental.pallas import tpu as pltpu


def _round_up(x: int, m: int) -> int:
    return ((x + m - 1) // m) * m


def _cdiv(a: int, b: int) -> int:
    return -(-a // b)


def _mlp_kernel(x_ref, w1_ref, b1_ref, w2_ref, b2_ref, o_ref):
    # Cast x to the MXU operand dtype in-kernel (VPU work, hidden under DMA).
    x = x_ref[...].astype(w1_ref.dtype)
    # Layer 1: MXU dot with f32 accumulation, bias add + ReLU in f32.
    h = jnp.dot(x, w1_ref[...], preferred_element_type=jnp.float32)
    h = jnp.maximum(h + b1_ref[...], 0.0)
    # Layer 2: back to operand dtype for the MXU, bias add in f32.
    y = jnp.dot(h.astype(w2_ref.dtype), w2_ref[...],
                preferred_element_type=jnp.float32)
    o_ref[...] = (y + b2_ref[...]).astype(o_ref.dtype)


def pack_params(w1, b1, w2, b2, *, compute_dtype=jnp.bfloat16):
    """Pack/pad/cast parameters ONCE (loop-invariant; do not call per step).

    Args:
      w1: [in_features, hidden_features]   (transposed vs PyTorch's [out, in])
      b1: [hidden_features]
      w2: [hidden_features, out_features]
      b2: [out_features]
    """
    IN, HID = w1.shape
    OUT = w2.shape[1]
    assert b1.shape == (HID,) and w2.shape == (HID, OUT) and b2.shape == (OUT,)

    HID_PAD = _round_up(HID, 128)          # lane-dense hidden activations

    w1_p = jnp.zeros((IN, HID_PAD), compute_dtype)
    w1_p = w1_p.at[:, :HID].set(w1.astype(compute_dtype))
    b1_p = jnp.zeros((1, HID_PAD), jnp.float32).at[0, :HID].set(b1)
    w2_p = jnp.zeros((HID_PAD, OUT), compute_dtype)
    w2_p = w2_p.at[:HID, :].set(w2.astype(compute_dtype))
    b2_p = b2.reshape(1, OUT).astype(jnp.float32)
    return {"w1": w1_p, "b1": b1_p, "w2": w2_p, "b2": b2_p}


def _choose_tiles(B: int, block_b: int):
    """Balanced batch tiles (multiple-of-8 rows), >=2 tiles when B >= 16."""
    B8 = _round_up(max(B, 1), 8)
    nt = _cdiv(B8, block_b)
    if nt == 1 and B8 >= 16:
        nt = 2                              # give v7x's two TensorCores work
    TB = _round_up(_cdiv(B8, nt), 8)
    nt = _cdiv(B8, TB)
    return TB, nt * TB


def linear_qnet_forward(x, params, *, block_b=2048,
                        vmem_limit_bytes=48 * 1024 * 1024):
    """Fused forward pass of LinearQNet.

    Args:
      x:      [B, in_features] float32
      params: output of pack_params().
    Returns:
      [B, out_features] float32
    """
    B, IN = x.shape
    w1_p, b1_p, w2_p, b2_p = params["w1"], params["b1"], params["w2"], params["b2"]
    assert w1_p.shape[0] == IN
    HID_PAD = w1_p.shape[1]
    OUT = w2_p.shape[1]

    TB, B_pad = _choose_tiles(B, block_b)
    grid = (B_pad // TB,)

    x_in = x if B_pad == B else jnp.pad(x, ((0, B_pad - B), (0, 0)))

    flops = 2 * B_pad * (IN * HID_PAD + HID_PAD * OUT)
    bytes_accessed = (x_in.size * x_in.dtype.itemsize
                      + w1_p.size * w1_p.dtype.itemsize
                      + b1_p.size * 4
                      + w2_p.size * w2_p.dtype.itemsize
                      + b2_p.size * 4
                      + B_pad * OUT * 4)

    y = pl.pallas_call(
        _mlp_kernel,
        out_shape=jax.ShapeDtypeStruct((B_pad, OUT), jnp.float32),
        grid_spec=pltpu.PrefetchScalarGridSpec(
            num_scalar_prefetch=0,
            grid=grid,
            in_specs=[
                # x: one batch tile per grid step (full input width = full dim)
                pl.BlockSpec((TB, IN), lambda i: (i, 0)),
                # weights / biases: constant index_maps -> VMEM-resident
                pl.BlockSpec((IN, HID_PAD), lambda i: (0, 0)),
                pl.BlockSpec((1, HID_PAD), lambda i: (0, 0)),
                pl.BlockSpec((HID_PAD, OUT), lambda i: (0, 0)),
                pl.BlockSpec((1, OUT), lambda i: (0, 0)),
            ],
            # Natural-width output block: contiguous HBM writeback, no 32x
            # lane-padding write amplification.
            out_specs=pl.BlockSpec((TB, OUT), lambda i: (i, 0)),
        ),
        compiler_params=pltpu.CompilerParams(
            dimension_semantics=("parallel",),   # megacore: split batch tiles
            vmem_limit_bytes=vmem_limit_bytes,   # <= 48 MiB: safe on v7x's 64 MiB
        ),
        cost_estimate=pl.CostEstimate(
            flops=flops, transcendentals=0, bytes_accessed=bytes_accessed),
    )(x_in, w1_p, b1_p, w2_p, b2_p)

    return y[:B] if B_pad != B else y


def init_params(key, in_features, hidden_features, out_features):
    """Deterministic init mimicking nn.Linear's uniform(-1/sqrt(fan_in), +)."""
    k1, k2, k3, k4 = jax.random.split(key, 4)
    bound1 = 1.0 / jnp.sqrt(in_features)
    bound2 = 1.0 / jnp.sqrt(hidden_features)
    # Stored already transposed to [in, out] for the kernel.
    w1 = jax.random.uniform(k1, (in_features, hidden_features), jnp.float32,
                            minval=-bound1, maxval=bound1)
    b1 = jax.random.uniform(k2, (hidden_features,), jnp.float32,
                            minval=-bound1, maxval=bound1)
    w2 = jax.random.uniform(k3, (hidden_features, out_features), jnp.float32,
                            minval=-bound2, maxval=bound2)
    b2 = jax.random.uniform(k4, (out_features,), jnp.float32,
                            minval=-bound2, maxval=bound2)
    return w1, b1, w2, b2


# TODO(synk): LinearQNet.save() (torch checkpoint I/O) has no kernel equivalent.

if __name__ == "__main__":
    # Small shapes consistent with a Q-network: state 16 -> hidden 32 -> 4 actions.
    B, IN, HID, OUT = 8, 16, 32, 4

    key = jax.random.PRNGKey(0)
    kx, kp, kx2 = jax.random.split(key, 3)
    x = jax.random.normal(kx, (B, IN), jnp.float32)
    w1, b1, w2, b2 = init_params(kp, IN, HID, OUT)

    # Pure-JAX reference.
    y_ref = jnp.maximum(x @ w1 + b1, 0.0) @ w2 + b2

    fwd = jax.jit(linear_qnet_forward)

    # f32-operand path: parity with the reference.
    params_f32 = pack_params(w1, b1, w2, b2, compute_dtype=jnp.float32)
    y_f32 = jax.block_until_ready(fwd(x, params_f32))
    assert y_f32.shape == (B, OUT)
    assert jnp.allclose(y_f32, y_ref, atol=1e-5, rtol=1e-5)

    # Default bf16-operand path (f32 accumulation, f32 biases).
    params_bf16 = pack_params(w1, b1, w2, b2)
    y_bf16 = jax.block_until_ready(fwd(x, params_bf16))
    assert y_bf16.shape == (B, OUT)
    assert jnp.allclose(y_bf16, y_ref, atol=5e-2, rtol=5e-2)

    # Ragged batch: exercises batch padding + >=2 grid steps (v7x megacore path).
    B2 = 20
    x2 = jax.random.normal(kx2, (B2, IN), jnp.float32)
    y2_ref = jnp.maximum(x2 @ w1 + b1, 0.0) @ w2 + b2
    y2 = jax.block_until_ready(fwd(x2, params_f32))
    assert y2.shape == (B2, OUT)
    assert jnp.allclose(y2, y2_ref, atol=1e-5, rtol=1e-5)

    print("KERNEL_OK")
</pallas_src>

<mosaic_0001>
module attributes {stable_mosaic.version = 11 : i64} {
  func.func @_mlp_kernel(%arg0: i32, %arg1: memref<8x16xf32, #tpu.memory_space<vmem>>, %arg2: memref<16x128xf32, #tpu.memory_space<vmem>>, %arg3: memref<1x128xf32, #tpu.memory_space<vmem>>, %arg4: memref<128x4xf32, #tpu.memory_space<vmem>>, %arg5: memref<1x4xf32, #tpu.memory_space<vmem>>, %arg6: memref<8x4xf32, #tpu.memory_space<vmem>>) attributes {dimension_semantics = [#tpu.dimension_semantics<parallel>], iteration_bounds = array<i64: 1>, scalar_prefetch = 0 : i64, scratch_operands = 0 : i64, tpu.core_type = #tpu.core_type<tc>, window_params = [{transform_indices = @transform_0, window_bounds = array<i64: 8, 16>}, {pipeline_mode = #tpu.pipeline_mode<synchronous>, transform_indices = @transform_1, window_bounds = array<i64: 16, 128>}, {pipeline_mode = #tpu.pipeline_mode<synchronous>, transform_indices = @transform_2, window_bounds = array<i64: 1, 128>}, {pipeline_mode = #tpu.pipeline_mode<synchronous>, transform_indices = @transform_3, window_bounds = array<i64: 128, 4>}, {pipeline_mode = #tpu.pipeline_mode<synchronous>, transform_indices = @transform_4, window_bounds = array<i64: 1, 4>}, {transform_indices = @transform_5, window_bounds = array<i64: 8, 4>}]} {
    %c0 = arith.constant 0 : index
    %c0_0 = arith.constant 0 : index
    %0 = vector.load %arg1[%c0, %c0_0] : memref<8x16xf32, #tpu.memory_space<vmem>>, vector<8x16xf32>
    %c0_1 = arith.constant 0 : index
    %c0_2 = arith.constant 0 : index
    %1 = vector.load %arg2[%c0_1, %c0_2] : memref<16x128xf32, #tpu.memory_space<vmem>>, vector<16x128xf32>
    %cst = arith.constant dense<0.000000e+00> : vector<8x128xf32>
    %2 = tpu.matmul %0, %1, %cst {dimension_numbers = #tpu.dot_dimension_numbers<[1], [0], [0], [1], [0, 0, 1, 1], [], []>} : vector<8x16xf32>, vector<16x128xf32>, vector<8x128xf32> -> vector<8x128xf32>
    %c0_3 = arith.constant 0 : index
    %c0_4 = arith.constant 0 : index
    %3 = vector.load %arg3[%c0_3, %c0_4] : memref<1x128xf32, #tpu.memory_space<vmem>>, vector<1x128xf32>
    %4 = vector.broadcast %3 : vector<1x128xf32> to vector<8x128xf32>
    %5 = arith.addf %2, %4 : vector<8x128xf32>
    %cst_5 = arith.constant 0.000000e+00 : f32
    %6 = vector.broadcast %cst_5 : f32 to vector<8x128xf32>
    %7 = arith.maximumf %5, %6 : vector<8x128xf32>
    %c0_6 = arith.constant 0 : index
    %c0_7 = arith.constant 0 : index
    %8 = vector.load %arg4[%c0_6, %c0_7] : memref<128x4xf32, #tpu.memory_space<vmem>>, vector<128x4xf32>
    %cst_8 = arith.constant dense<0.000000e+00> : vector<8x4xf32>
    %9 = tpu.matmul %7, %8, %cst_8 {dimension_numbers = #tpu.dot_dimension_numbers<[1], [0], [0], [1], [0, 0, 1, 1], [], []>} : vector<8x128xf32>, vector<128x4xf32>, vector<8x4xf32> -> vector<8x4xf32>
    %c0_9 = arith.constant 0 : index
    %c0_10 = arith.constant 0 : index
    %10 = vector.load %arg5[%c0_9, %c0_10] : memref<1x4xf32, #tpu.memory_space<vmem>>, vector<1x4xf32>
    %11 = vector.broadcast %10 : vector<1x4xf32> to vector<8x4xf32>
    %12 = arith.addf %9, %11 : vector<8x4xf32>
    %c0_11 = arith.constant 0 : index
    %c0_12 = arith.constant 0 : index
    %13 = vector.load %arg6[%c0_11, %c0_12] : memref<8x4xf32, #tpu.memory_space<vmem>>, vector<8x4xf32>
    tpu.vector_store %arg6[%c0_11, %c0_12], %12 {strides = array<i32>} : memref<8x4xf32, #tpu.memory_space<vmem>>, vector<8x4xf32>,
    return
  }
  func.func @transform_0(%arg0: i32) -> (i32, i32) {
    %c0_i32 = arith.constant 0 : i32
    %c0_i32_0 = arith.constant 0 : i32
    return %arg0, %c0_i32 : i32, i32
  }
  func.func @transform_1(%arg0: i32) -> (i32, i32) {
    %c0_i32 = arith.constant 0 : i32
    %c0_i32_0 = arith.constant 0 : i32
    %c0_i32_1 = arith.constant 0 : i32
    return %c0_i32, %c0_i32_0 : i32, i32
  }
  func.func @transform_2(%arg0: i32) -> (i32, i32) {
    %c0_i32 = arith.constant 0 : i32
    %c0_i32_0 = arith.constant 0 : i32
    %c0_i32_1 = arith.constant 0 : i32
    return %c0_i32, %c0_i32_0 : i32, i32
  }
  func.func @transform_3(%arg0: i32) -> (i32, i32) {
    %c0_i32 = arith.constant 0 : i32
    %c0_i32_0 = arith.constant 0 : i32
    %c0_i32_1 = arith.constant 0 : i32
    return %c0_i32, %c0_i32_0 : i32, i32
  }
  func.func @transform_4(%arg0: i32) -> (i32, i32) {
    %c0_i32 = arith.constant 0 : i32
    %c0_i32_0 = arith.constant 0 : i32
    %c0_i32_1 = arith.constant 0 : i32
    return %c0_i32, %c0_i32_0 : i32, i32
  }
  func.func @transform_5(%arg0: i32) -> (i32, i32) {
    %c0_i32 = arith.constant 0 : i32
    %c0_i32_0 = arith.constant 0 : i32
    return %arg0, %c0_i32 : i32, i32
  }
}

</mosaic_0001>

<bundles_post_ra>
// kernel: linear_qnet_forward.1
= control target key start
LH: loop header
LB: loop body
LE: loop exit
PB: predicated region body
PF: predicated region fallthrough
CT: control target
= control target key end

     0   :  { %v299_v0 = vmov 0.0|0.0   ;;  %vm300_vm0 = vmmov 0   ;;  %v301_v3 = vmov 0.0   ;;  %vm30_vm1 = vcmask 130048   ;;  %s398_s1 = inlined_call_operand.vmem [shape: f32[16,128], index: 1, kind: input, shape index: {}]   ;;  %s399_s3 = inlined_call_operand.vmem [shape: f32[128,4], index: 3, kind: input, shape index: {}]   ;;  %s400_s0 = inlined_call_operand.vmem [shape: f32[8,16], index: 0, kind: input, shape index: {}]   ;;  %s401_s2 = inlined_call_operand.vmem [shape: f32[1,128], index: 2, kind: input, shape index: {}]   ;;  %s402_s4 = inlined_call_operand.vmem [shape: f32[1,4], index: 4, kind: input, shape index: {}]   ;;  %s403_s5 = inlined_call_operand.vmem [shape: f32[8,4], index: 5, kind: output, shape index: {}]  }
   0x1   :  { %269 = vmatprep.subr.bf16.mxu0 %v299_v0  ;;  %v21_v1 = vld [vmem:[%s398_s1] sm:$0xff]  ;;  %v22_v2 = vld [vmem:[%s398_s1 + $0x8] sm:$0xff]  ;;  %231 = vmatprep.mubr.msk.f32.mxu0 %vm300_vm0, %v301_v3  ;;  %v107_v7 = vld [vmem:[%s399_s3 + $0x10] sm:$0xff]  ;;  %vm198_vm2 = vcmask 31744  }
   0x2   :  { %v270_v4 = vpack.c.bf16 %v22_v2, %v21_v1  ;;  %272 = vmatprep.subr.bf16.mxu1 %v299_v0  ;;  %v105_v5 = vld [vmem:[%s399_s3] sm:$0xff]  ;;  %v106_v6 = vld [vmem:[%s399_s3 + $0x8] sm:$0xff]  ;;  %266 = vmatprep.mubr.msk.f32.mxu1 %vm300_vm0, %v301_v3  ;;  %v108_v9 = vld [vmem:[%s399_s3 + $0x18] sm:$0xff] }
   0x3   :  { %v273_v8 = vpack.c.bf16 %v106_v6, %v105_v5  ;;  %v20_v10 = vld [vmem:[%s400_s0] sm:$0xff]  ;;  %v276_v11 = vpack.c.bf16 %v108_v9, %v107_v7  ;;  %v110_v13 = vld [vmem:[%s399_s3 + $0x28] sm:$0xff]  ;;  %v111_v15 = vld [vmem:[%s399_s3 + $0x30] sm:$0xff] }
   0x4   :  { %271 = vmatpush3.bf16.msra.mxu0 %v270_v4  ;;  %v109_v12 = vld [vmem:[%s399_s3 + $0x20] sm:$0xff]  ;;  %v112_v16 = vld [vmem:[%s399_s3 + $0x38] sm:$0xff]  ;;  %v114_v19 = vld [vmem:[%s399_s3 + $0x48] sm:$0xff] }
   0x5   :  { %274 = vmatpush3.bf16.msra.mxu1 %v273_v8  ;;  %v279_v14 = vpack.c.bf16 %v110_v13, %v109_v12  ;;  %v282_v17 = vpack.c.bf16 %v112_v16, %v111_v15  ;;  %v113_v18 = vld [vmem:[%s399_s3 + $0x40] sm:$0xff]  ;;  %v115_v21 = vld [vmem:[%s399_s3 + $0x50] sm:$0xff]  ;;  %v116_v22 = vld [vmem:[%s399_s3 + $0x58] sm:$0xff] }
   0x6   :  { %275 = vmatprep.subr.bf16.mxu1 %v299_v0  ;;  %v285_v20 = vpack.c.bf16 %v114_v19, %v113_v18  ;;  %v288_v23 = vpack.c.bf16 %v116_v22, %v115_v21  ;;  %v117_v24 = vld [vmem:[%s399_s3 + $0x60] sm:$0xff]  ;;  %v118_v25 = vld [vmem:[%s399_s3 + $0x68] sm:$0xff]  ;;  %v119_v27 = vld [vmem:[%s399_s3 + $0x70] sm:$0xff] }
   0x7   :  { %232 = vmatmul.mubr.msk.f32.vlgmr.msra.gmra.mrb[0].mxu0 %vm30_vm1, %v20_v10  ;;  %v291_v26 = vpack.c.bf16 %v118_v25, %v117_v24  ;;  %v120_v28 = vld [vmem:[%s399_s3 + $0x78] sm:$0xff]  ;;  %v204_v30 = vld [vmem:[%s401_s2] ss:$0 sm:$0xff] }
   0x8   :  { %v294_v29 = vpack.c.bf16 %v120_v28, %v119_v27  ;;  %v206_v35 = vld [vmem:[%s402_s4] ss:$0 sm:$0xff] }
   0x9   :  { %277 = vmatpush3.bf16.msra.mxu1 %v276_v11 }
   0xa   :  { %278 = vmatprep.subr.bf16.mxu1 %v299_v0 }
   0xd   :  { %280 = vmatpush3.bf16.msra.mxu1 %v279_v14 }
   0xe   :  { %281 = vmatprep.subr.bf16.mxu1 %v299_v0 }
  0x11   :  { %283 = vmatpush3.bf16.msra.mxu1 %v282_v17 }
  0x12   :  { %284 = vmatprep.subr.bf16.mxu1 %v299_v0 }
  0x15   :  { %286 = vmatpush3.bf16.msra.mxu1 %v285_v20 }
  0x16   :  { %287 = vmatprep.subr.bf16.mxu1 %v299_v0 }
  0x19   :  { %289 = vmatpush3.bf16.msra.mxu1 %v288_v23 }
  0x1a   :  { %290 = vmatprep.subr.bf16.mxu1 %v299_v0 }
  0x1d   :  { %292 = vmatpush3.bf16.msra.mxu1 %v291_v26 }
  0x1e   :  { %293 = vmatprep.subr.bf16.mxu1 %v299_v0 }
  0x21   :  { %295 = vmatpush3.bf16.msra.mxu1 %v294_v29 }
  0xda   :  { %v100_v31 = vpop.f32.mrb[0].mxu0 }
  0xdb   :  { %v101_v32 = vadd.f32 %v204_v30, %v100_v31  ;;  %v233_v33 = vpop.f32.mrb[1].mxu0 }
  0xdd   :  { %v104_v34 = vmax.f32 %v101_v32, 0.0 }
  0xdf   :  { %267 = vmatmul.mubr.f32.vlgmr.msra.gmra.mrb[0].mxu1 %v104_v34 }
 0x1b2   :  { %v194_v36 = vpop.f32.mrb[0].mxu1 }
 0x1b3   :  { %v195_v37 = vadd.f32 %v206_v35, %v194_v36  ;;  %v268_v38 = vpop.f32.mrb[1].mxu1 }
 0x1b5   :  { %199 = vst.msk [vmem:[%s403_s5] sm:$0xff] %vm198_vm2, %v195_v37 }

</bundles_post_ra>
